<compile_context>
chip_gen: v5e
topology: v5e:2x2
jax: 0.10.0
libtpu: 0.0.40
codegen_flags: <defaults>
</compile_context>

<pallas_src>
import jax
import jax.numpy as jnp
from jax.experimental import pallas as pl
from jax.experimental.pallas import tpu as pltpu

NEG_SLOPE = 0.01   # nn.LeakyReLU default negative_slope
BN_EPS = 1e-5      # nn.BatchNorm2d default eps
PAD0 = 16          # tile-aligned halo offset for the h-padded scratches (bf16 sublane tile)


def _leaky_relu(x):
    return jnp.where(x > 0, x, NEG_SLOPE * x)


def unet_block_kernel(x_ref, w1_ref, w2_ref, g1_ref, b1_ref, g2_ref, b2_ref,
                      sel_ref, selt_ref, out_ref, xpad_ref, ypad_ref):
    """Whole UNetConvBlock forward, lane-dense row layout.

    x_ref    : (N, H, WCINP)          bf16  lane-dense input rows, lane = w*Cin + ci
                                            (zero-padded to a 128 multiple)
    w1_ref   : (3*WCINP, WC)          bf16  stacked Toeplitz conv1 weights (kh along K)
    w2_ref   : (3*WC, WC)             bf16  stacked Toeplitz conv2 weights
    g*/b*    : (1, Cout)              f32   BatchNorm gamma / beta
    sel_ref  : (WC, Cout)             f32   lane -> channel one-hot (stats reduce)
    selt_ref : (Cout, WC)             f32   channel -> lane one-hot (broadcast back)
    out_ref  : (N, H, WC)             f32
    xpad_ref : (N, 2*PAD0+H, WCINP)   bf16  scratch: h-padded input (interior at row PAD0)
    ypad_ref : (N, 2*PAD0+H, WC)      bf16  scratch: h-padded BN1 output
    """
    N, H, WCINP = x_ref.shape
    WC = out_ref.shape[-1]
    COUT = g1_ref.shape[-1]
    NH = N * H
    inv_count = 1.0 / float(NH * (WC // COUT))   # 1 / (N*H*W)

    def batchnorm(act, g_ref, b_ref):
        # Training-mode batch statistics (biased variance), single pass, fused
        # selector dots (one stats dot + one scale/shift dot per BatchNorm).
        # TODO(synk): switch to two-pass (centered) stats once N*H*W is large enough
        # that the E[x^2]-mean^2 form risks cancellation.
        s = jnp.sum(act, axis=0, keepdims=True)            # (1, WC)
        q = jnp.sum(act * act, axis=0, keepdims=True)      # (1, WC)
        row = jax.lax.broadcasted_iota(jnp.int32, (2, WC), 0)
        sq = jnp.where(row == 0, s, q)                     # (2, WC) stacked moments
        ch = jnp.dot(sq, sel_ref[...], preferred_element_type=jnp.float32)   # (2, Cout)
        mean = ch[0:1, :] * inv_count
        var = ch[1:2, :] * inv_count - mean * mean         # biased variance
        scale = g_ref[...] * jax.lax.rsqrt(var + BN_EPS)   # (1, Cout)
        shift = b_ref[...] - mean * scale
        row_c = jax.lax.broadcasted_iota(jnp.int32, (2, COUT), 0)
        ss = jnp.where(row_c == 0, scale, shift)           # (2, Cout)
        lane = jnp.dot(ss, selt_ref[...], preferred_element_type=jnp.float32)  # (2, WC)
        return act * lane[0:1, :] + lane[1:2, :]           # (NH, WC) f32

    # ---- in-kernel h-pad of the bf16 input (aligned zero-fill + aligned interior) ----
    x_now = x_ref[...]                                     # (N, H, WCINP) bf16, stays live
    xpad_ref[...] = jnp.zeros_like(xpad_ref)
    xpad_ref[:, PAD0:PAD0 + H, :] = x_now

    # ---- conv1: one MXU dot, K = 3*WCINP (kh=1 tap reuses the live input) ----
    win1 = jnp.concatenate(
        [xpad_ref[:, PAD0 - 1:PAD0 - 1 + H, :].reshape(NH, WCINP),   # kh = 0
         x_now.reshape(NH, WCINP),                                   # kh = 1
         xpad_ref[:, PAD0 + 1:PAD0 + 1 + H, :].reshape(NH, WCINP)],  # kh = 2
        axis=-1)
    acc1 = jnp.dot(win1, w1_ref[...], preferred_element_type=jnp.float32)   # (NH, WC)

    y = batchnorm(_leaky_relu(acc1), g1_ref, b1_ref)       # (NH, WC) f32
    y_b = y.astype(jnp.bfloat16)                           # single cast for conv2 / scratch

    # ---- h-pad BN1 output (bf16 scratch, aligned stores only) ----
    ypad_ref[...] = jnp.zeros_like(ypad_ref)
    ypad_ref[:, PAD0:PAD0 + H, :] = y_b.reshape(N, H, WC)

    # ---- conv2: one MXU dot, K = 3*WC (kh=1 tap reuses the live y) ----
    win2 = jnp.concatenate(
        [ypad_ref[:, PAD0 - 1:PAD0 - 1 + H, :].reshape(NH, WC),      # kh = 0
         y_b,                                                        # kh = 1
         ypad_ref[:, PAD0 + 1:PAD0 + 1 + H, :].reshape(NH, WC)],     # kh = 2
        axis=-1)
    acc2 = jnp.dot(win2, w2_ref[...], preferred_element_type=jnp.float32)

    z = batchnorm(_leaky_relu(acc2), g2_ref, b2_ref)
    out_ref[...] = z.reshape(N, H, WC)


def _toeplitz_weights(w_oihw, width):
    """Per-kh Toeplitz matrices folding the kw taps and the 1-pixel w-padding.

    T[kh, w_in*Cin + ci, w_out*Cout + co] = w[co, ci, kh, w_in - w_out + 1]
    when 0 <= w_in - w_out + 1 < 3 (and 0 <= w_in < W), else 0.
    """
    cout, cin, kh_sz, kw_sz = w_oihw.shape
    w_hwio = jnp.transpose(w_oihw, (2, 3, 1, 0)).astype(jnp.float32)  # (3,3,Ci,Co)
    w_in = jnp.arange(width)[:, None]
    w_out = jnp.arange(width)[None, :]
    kw = w_in - w_out + 1                                   # (W, W)
    valid = ((kw >= 0) & (kw < kw_sz)).astype(jnp.float32)
    kw_safe = jnp.clip(kw, 0, kw_sz - 1)
    blocks = w_hwio[:, kw_safe, :, :] * valid[None, :, :, None, None]  # (3,W,W,Ci,Co)
    t = jnp.transpose(blocks, (0, 1, 3, 2, 4)).reshape(kh_sz, width * cin, width * cout)
    return t


def unet_conv_block_rows(x_rows, w1_oihw, w2_oihw, gamma1, beta1, gamma2, beta2, *, width):
    """Lane-dense interchange form: (N, H, W*Cin) rows in -> (N, H, W*Cout) f32 rows out.

    This is the format chained UNet blocks should pass between each other so the
    NCHW transposes only happen at the network boundary.
    """
    N, H, WCIN = x_rows.shape
    W = width
    Cout = w1_oihw.shape[0]
    WC = W * Cout
    LANE = 128
    WCINP = ((WCIN + LANE - 1) // LANE) * LANE   # lane-align conv1's K chunks

    # bf16 lane-dense input (halves HBM->VMEM DMA), zero-padded on the lane axis.
    x_b = x_rows.astype(jnp.bfloat16)
    if WCINP != WCIN:
        x_b = jnp.pad(x_b, ((0, 0), (0, 0), (0, WCINP - WCIN)))

    # Toeplitz conv weights: kw taps + w-padding folded; kh stacked along K.
    w1_t = _toeplitz_weights(w1_oihw, W)                              # (3, WCIN, WC)
    if WCINP != WCIN:
        w1_t = jnp.pad(w1_t, ((0, 0), (0, WCINP - WCIN), (0, 0)))     # zero K rows for pad lanes
    w1_t = w1_t.reshape(3 * WCINP, WC).astype(jnp.bfloat16)
    w2_t = _toeplitz_weights(w2_oihw, W).reshape(3 * WC, WC).astype(jnp.bfloat16)

    # lane <-> channel one-hot selectors for the BatchNorm stat reduce / broadcast.
    lane_ch = jnp.arange(WC) % Cout
    sel = (lane_ch[:, None] == jnp.arange(Cout)[None, :]).astype(jnp.float32)  # (WC, Cout)
    selt = jnp.transpose(sel)                                                  # (Cout, WC)

    g1 = gamma1.reshape(1, Cout).astype(jnp.float32)
    b1 = beta1.reshape(1, Cout).astype(jnp.float32)
    g2 = gamma2.reshape(1, Cout).astype(jnp.float32)
    b2 = beta2.reshape(1, Cout).astype(jnp.float32)

    vmem = pl.BlockSpec(memory_space=pltpu.MemorySpace.VMEM)
    hpad = 2 * PAD0 + H

    out_rows = pl.pallas_call(
        unet_block_kernel,
        out_shape=jax.ShapeDtypeStruct((N, H, WC), jnp.float32),
        in_specs=[vmem] * 9,
        out_specs=vmem,
        scratch_shapes=[pltpu.VMEM((N, hpad, WCINP), jnp.bfloat16),
                        pltpu.VMEM((N, hpad, WC), jnp.bfloat16)],
        # 48 MiB keeps headroom on v7x's 64 MiB VMEM while being plenty for 128 MiB chips.
        compiler_params=pltpu.CompilerParams(vmem_limit_bytes=48 * 1024 * 1024),
    )(x_b, w1_t, w2_t, g1, b1, g2, b2, sel, selt)
    return out_rows


def unet_conv_block(x_nchw, w1_oihw, w2_oihw, gamma1, beta1, gamma2, beta2):
    """NCHW boundary wrapper (PyTorch layouts). Chained blocks should use
    unet_conv_block_rows directly to avoid per-block NCHW round trips."""
    N, Cin, H, W = x_nchw.shape
    Cout = w1_oihw.shape[0]
    x_rows = jnp.transpose(x_nchw, (0, 2, 3, 1)).reshape(N, H, W * Cin)
    out_rows = unet_conv_block_rows(x_rows, w1_oihw, w2_oihw,
                                    gamma1, beta1, gamma2, beta2, width=W)
    return jnp.transpose(out_rows.reshape(N, H, W, Cout), (0, 3, 1, 2))


def _reference(x, w1, w2, g1, b1, g2, b2):
    """Pure-JAX f32 reference (training-mode BatchNorm semantics, no conv bias)."""
    def conv(v, w):
        return jax.lax.conv_general_dilated(
            v, w, window_strides=(1, 1), padding=((1, 1), (1, 1)),
            dimension_numbers=("NCHW", "OIHW", "NCHW"))

    def bn(v, g, b):
        mean = jnp.mean(v, axis=(0, 2, 3), keepdims=True)
        var = jnp.mean((v - mean) ** 2, axis=(0, 2, 3), keepdims=True)
        return ((v - mean) * jax.lax.rsqrt(var + BN_EPS)
                * g.reshape(1, -1, 1, 1) + b.reshape(1, -1, 1, 1))

    y = bn(_leaky_relu(conv(x, w1)), g1, b1)
    z = bn(_leaky_relu(conv(y, w2)), g2, b2)
    return z


def _init_params(key, in_size, out_size, k=3):
    """Deterministic synthetic parameters (PyTorch shapes, no checkpoint)."""
    k1, k2, k3, k4 = jax.random.split(key, 4)
    w1 = jax.random.normal(k1, (out_size, in_size, k, k), jnp.float32) / jnp.sqrt(in_size * k * k)
    w2 = jax.random.normal(k2, (out_size, out_size, k, k), jnp.float32) / jnp.sqrt(out_size * k * k)
    gamma1 = 1.0 + 0.1 * jax.random.normal(k3, (out_size,), jnp.float32)
    beta1 = 0.1 * jax.random.normal(k4, (out_size,), jnp.float32)
    gamma2 = 1.0 - 0.05 * jax.random.normal(k3, (out_size,), jnp.float32)
    beta2 = 0.05 * jax.random.normal(k4, (out_size,), jnp.float32)
    return w1, w2, gamma1, beta1, gamma2, beta2


if __name__ == "__main__":
    key = jax.random.PRNGKey(0)
    kx, kp = jax.random.split(key)

    N, Cin, Cout, H, W = 2, 4, 8, 16, 16
    x = jax.random.normal(kx, (N, Cin, H, W), jnp.float32)   # NCHW, like PyTorch

    w1, w2, g1, b1, g2, b2 = _init_params(kp, Cin, Cout)

    fwd = jax.jit(unet_conv_block)
    out = jax.block_until_ready(fwd(x, w1, w2, g1, b1, g2, b2))

    assert out.shape == (N, Cout, H, W), out.shape
    assert bool(jnp.all(jnp.isfinite(out)))

    # correctness vs. f32 reference (kernel feeds the MXU bf16 -> loose tolerance)
    ref = _reference(x, w1, w2, g1, b1, g2, b2)
    max_err = float(jnp.max(jnp.abs(out - ref)))
    assert max_err < 1e-1, max_err

    print("KERNEL_OK")
</pallas_src>

<mosaic_0001>
module attributes {stable_mosaic.version = 11 : i64} {
  func.func @unet_block_kernel(%arg0: memref<2x16x128xbf16, #tpu.memory_space<vmem>>, %arg1: memref<384x128xbf16, #tpu.memory_space<vmem>>, %arg2: memref<384x128xbf16, #tpu.memory_space<vmem>>, %arg3: memref<1x8xf32, #tpu.memory_space<vmem>>, %arg4: memref<1x8xf32, #tpu.memory_space<vmem>>, %arg5: memref<1x8xf32, #tpu.memory_space<vmem>>, %arg6: memref<1x8xf32, #tpu.memory_space<vmem>>, %arg7: memref<128x8xf32, #tpu.memory_space<vmem>>, %arg8: memref<8x128xf32, #tpu.memory_space<vmem>>, %arg9: memref<2x16x128xf32, #tpu.memory_space<vmem>>, %arg10: memref<2x48x128xbf16, #tpu.memory_space<vmem>>, %arg11: memref<2x48x128xbf16, #tpu.memory_space<vmem>>) attributes {dimension_semantics = [], scalar_prefetch = 0 : i64, scratch_operands = 2 : i64, tpu.core_type = #tpu.core_type<tc>} {
    %c0 = arith.constant 0 : index
    %c0_0 = arith.constant 0 : index
    %c0_1 = arith.constant 0 : index
    %0 = vector.load %arg0[%c0, %c0_0, %c0_1] : memref<2x16x128xbf16, #tpu.memory_space<vmem>>, vector<2x16x128xbf16>
    %cst = arith.constant 0.000000e+00 : bf16
    %1 = vector.broadcast %cst : bf16 to vector<2x48x128xbf16>
    %c0_2 = arith.constant 0 : index
    %c0_3 = arith.constant 0 : index
    %c0_4 = arith.constant 0 : index
    %2 = vector.load %arg10[%c0_2, %c0_3, %c0_4] : memref<2x48x128xbf16, #tpu.memory_space<vmem>>, vector<2x48x128xbf16>
    tpu.vector_store %arg10[%c0_2, %c0_3, %c0_4], %1 {strides = array<i32>} : memref<2x48x128xbf16, #tpu.memory_space<vmem>>, vector<2x48x128xbf16>,
    %c0_5 = arith.constant 0 : index
    %c16 = arith.constant 16 : index
    %c0_6 = arith.constant 0 : index
    %3 = vector.load %arg10[%c0_5, %c16, %c0_6] : memref<2x48x128xbf16, #tpu.memory_space<vmem>>, vector<2x16x128xbf16>
    tpu.vector_store %arg10[%c0_5, %c16, %c0_6], %0 {strides = array<i32>} : memref<2x48x128xbf16, #tpu.memory_space<vmem>>, vector<2x16x128xbf16>,
    %c0_7 = arith.constant 0 : index
    %c15 = arith.constant 15 : index
    %c0_8 = arith.constant 0 : index
    %4 = vector.load %arg10[%c0_7, %c15, %c0_8] : memref<2x48x128xbf16, #tpu.memory_space<vmem>>, vector<2x16x128xbf16>
    %5 = vector.shape_cast %4 : vector<2x16x128xbf16> to vector<32x128xbf16>
    %6 = vector.shape_cast %0 : vector<2x16x128xbf16> to vector<32x128xbf16>
    %c0_9 = arith.constant 0 : index
    %c17 = arith.constant 17 : index
    %c0_10 = arith.constant 0 : index
    %7 = vector.load %arg10[%c0_9, %c17, %c0_10] : memref<2x48x128xbf16, #tpu.memory_space<vmem>>, vector<2x16x128xbf16>
    %8 = vector.shape_cast %7 : vector<2x16x128xbf16> to vector<32x128xbf16>
    %9 = tpu.concatenate %5, %6, %8 in 1 : vector<32x128xbf16>, vector<32x128xbf16>, vector<32x128xbf16> -> vector<32x384xbf16>
    %c0_11 = arith.constant 0 : index
    %c0_12 = arith.constant 0 : index
    %10 = vector.load %arg1[%c0_11, %c0_12] : memref<384x128xbf16, #tpu.memory_space<vmem>>, vector<384x128xbf16>
    %cst_13 = arith.constant dense<0.000000e+00> : vector<32x128xf32>
    %11 = tpu.matmul %9, %10, %cst_13 {dimension_numbers = #tpu.dot_dimension_numbers<[1], [0], [0], [1], [0, 0, 1, 1], [], []>} : vector<32x384xbf16>, vector<384x128xbf16>, vector<32x128xf32> -> vector<32x128xf32>
    %cst_14 = arith.constant 0.000000e+00 : f32
    %12 = vector.broadcast %cst_14 : f32 to vector<32x128xf32>
    %13 = arith.cmpf ogt, %11, %12 : vector<32x128xf32>
    %cst_15 = arith.constant 0.00999999977 : f32
    %14 = vector.broadcast %cst_15 : f32 to vector<32x128xf32>
    %15 = arith.mulf %14, %11 : vector<32x128xf32>
    %16 = arith.select %13, %11, %15 : vector<32x128xi1>, vector<32x128xf32>
    %cst_16 = arith.constant dense<0.000000e+00> : vector<128xf32>
    %17 = vector.multi_reduction <add>, %16, %cst_16 [0] : vector<32x128xf32> to vector<128xf32>
    %18 = vector.shape_cast %17 : vector<128xf32> to vector<1x128xf32>
    %19 = arith.mulf %16, %16 : vector<32x128xf32>
    %cst_17 = arith.constant dense<0.000000e+00> : vector<128xf32>
    %20 = vector.multi_reduction <add>, %19, %cst_17 [0] : vector<32x128xf32> to vector<128xf32>
    %21 = vector.shape_cast %20 : vector<128xf32> to vector<1x128xf32>
    %22 = tpu.iota {dimensions = array<i32: 0>} : vector<2x128xi32>
    %c0_i32 = arith.constant 0 : i32
    %23 = vector.broadcast %c0_i32 : i32 to vector<2x128xi32>
    %24 = arith.cmpi eq, %22, %23 : vector<2x128xi32>
    %25 = vector.shape_cast %18 : vector<1x128xf32> to vector<1x128xf32>
    %26 = vector.broadcast %25 : vector<1x128xf32> to vector<2x128xf32>
    %27 = vector.shape_cast %21 : vector<1x128xf32> to vector<1x128xf32>
    %28 = vector.broadcast %27 : vector<1x128xf32> to vector<2x128xf32>
    %29 = arith.select %24, %26, %28 : vector<2x128xi1>, vector<2x128xf32>
    %c0_18 = arith.constant 0 : index
    %c0_19 = arith.constant 0 : index
    %30 = vector.load %arg7[%c0_18, %c0_19] : memref<128x8xf32, #tpu.memory_space<vmem>>, vector<128x8xf32>
    %cst_20 = arith.constant dense<0.000000e+00> : vector<2x8xf32>
    %31 = tpu.matmul %29, %30, %cst_20 {dimension_numbers = #tpu.dot_dimension_numbers<[1], [0], [0], [1], [0, 0, 1, 1], [], []>} : vector<2x128xf32>, vector<128x8xf32>, vector<2x8xf32> -> vector<2x8xf32>
    %32 = vector.extract_strided_slice %31 {offsets = [0, 0], sizes = [1, 8], strides = [1, 1]} : vector<2x8xf32> to vector<1x8xf32>
    %cst_21 = arith.constant 0.001953125 : f32
    %33 = vector.broadcast %cst_21 : f32 to vector<1x8xf32>
    %34 = arith.mulf %32, %33 : vector<1x8xf32>
    %35 = vector.extract_strided_slice %31 {offsets = [1, 0], sizes = [1, 8], strides = [1, 1]} : vector<2x8xf32> to vector<1x8xf32>
    %cst_22 = arith.constant 0.001953125 : f32
    %36 = vector.broadcast %cst_22 : f32 to vector<1x8xf32>
    %37 = arith.mulf %35, %36 : vector<1x8xf32>
    %38 = arith.mulf %34, %34 : vector<1x8xf32>
    %39 = arith.subf %37, %38 : vector<1x8xf32>
    %c0_23 = arith.constant 0 : index
    %c0_24 = arith.constant 0 : index
    %40 = vector.load %arg3[%c0_23, %c0_24] : memref<1x8xf32, #tpu.memory_space<vmem>>, vector<1x8xf32>
    %cst_25 = arith.constant 9.99999974E-6 : f32
    %41 = vector.broadcast %cst_25 : f32 to vector<1x8xf32>
    %42 = arith.addf %39, %41 : vector<1x8xf32>
    %43 = math.rsqrt %42 : vector<1x8xf32>
    %44 = arith.mulf %40, %43 : vector<1x8xf32>
    %c0_26 = arith.constant 0 : index
    %c0_27 = arith.constant 0 : index
    %45 = vector.load %arg4[%c0_26, %c0_27] : memref<1x8xf32, #tpu.memory_space<vmem>>, vector<1x8xf32>
    %46 = arith.mulf %34, %44 : vector<1x8xf32>
    %47 = arith.subf %45, %46 : vector<1x8xf32>
    %48 = tpu.iota {dimensions = array<i32: 0>} : vector<2x8xi32>
    %c0_i32_28 = arith.constant 0 : i32
    %49 = vector.broadcast %c0_i32_28 : i32 to vector<2x8xi32>
    %50 = arith.cmpi eq, %48, %49 : vector<2x8xi32>
    %51 = vector.shape_cast %44 : vector<1x8xf32> to vector<1x8xf32>
    %52 = vector.broadcast %51 : vector<1x8xf32> to vector<2x8xf32>
    %53 = vector.shape_cast %47 : vector<1x8xf32> to vector<1x8xf32>
    %54 = vector.broadcast %53 : vector<1x8xf32> to vector<2x8xf32>
    %55 = arith.select %50, %52, %54 : vector<2x8xi1>, vector<2x8xf32>
    %c0_29 = arith.constant 0 : index
    %c0_30 = arith.constant 0 : index
    %56 = vector.load %arg8[%c0_29, %c0_30] : memref<8x128xf32, #tpu.memory_space<vmem>>, vector<8x128xf32>
    %cst_31 = arith.constant dense<0.000000e+00> : vector<2x128xf32>
    %57 = tpu.matmul %55, %56, %cst_31 {dimension_numbers = #tpu.dot_dimension_numbers<[1], [0], [0], [1], [0, 0, 1, 1], [], []>} : vector<2x8xf32>, vector<8x128xf32>, vector<2x128xf32> -> vector<2x128xf32>
    %58 = vector.extract_strided_slice %57 {offsets = [0, 0], sizes = [1, 128], strides = [1, 1]} : vector<2x128xf32> to vector<1x128xf32>
    %59 = vector.broadcast %58 : vector<1x128xf32> to vector<32x128xf32>
    %60 = arith.mulf %16, %59 : vector<32x128xf32>
    %61 = vector.extract_strided_slice %57 {offsets = [1, 0], sizes = [1, 128], strides = [1, 1]} : vector<2x128xf32> to vector<1x128xf32>
    %62 = vector.broadcast %61 : vector<1x128xf32> to vector<32x128xf32>
    %63 = arith.addf %60, %62 : vector<32x128xf32>
    %64 = arith.truncf %63 : vector<32x128xf32> to vector<32x128xbf16>
    %cst_32 = arith.constant 0.000000e+00 : bf16
    %65 = vector.broadcast %cst_32 : bf16 to vector<2x48x128xbf16>
    %c0_33 = arith.constant 0 : index
    %c0_34 = arith.constant 0 : index
    %c0_35 = arith.constant 0 : index
    %66 = vector.load %arg11[%c0_33, %c0_34, %c0_35] : memref<2x48x128xbf16, #tpu.memory_space<vmem>>, vector<2x48x128xbf16>
    tpu.vector_store %arg11[%c0_33, %c0_34, %c0_35], %65 {strides = array<i32>} : memref<2x48x128xbf16, #tpu.memory_space<vmem>>, vector<2x48x128xbf16>,
    %67 = vector.shape_cast %64 : vector<32x128xbf16> to vector<2x16x128xbf16>
    %c0_36 = arith.constant 0 : index
    %c16_37 = arith.constant 16 : index
    %c0_38 = arith.constant 0 : index
    %68 = vector.load %arg11[%c0_36, %c16_37, %c0_38] : memref<2x48x128xbf16, #tpu.memory_space<vmem>>, vector<2x16x128xbf16>
    tpu.vector_store %arg11[%c0_36, %c16_37, %c0_38], %67 {strides = array<i32>} : memref<2x48x128xbf16, #tpu.memory_space<vmem>>, vector<2x16x128xbf16>,
    %c0_39 = arith.constant 0 : index
    %c15_40 = arith.constant 15 : index
    %c0_41 = arith.constant 0 : index
    %69 = vector.load %arg11[%c0_39, %c15_40, %c0_41] : memref<2x48x128xbf16, #tpu.memory_space<vmem>>, vector<2x16x128xbf16>
    %70 = vector.shape_cast %69 : vector<2x16x128xbf16> to vector<32x128xbf16>
    %c0_42 = arith.constant 0 : index
    %c17_43 = arith.constant 17 : index
    %c0_44 = arith.constant 0 : index
    %71 = vector.load %arg11[%c0_42, %c17_43, %c0_44] : memref<2x48x128xbf16, #tpu.memory_space<vmem>>, vector<2x16x128xbf16>
    %72 = vector.shape_cast %71 : vector<2x16x128xbf16> to vector<32x128xbf16>
    %73 = tpu.concatenate %70, %64, %72 in 1 : vector<32x128xbf16>, vector<32x128xbf16>, vector<32x128xbf16> -> vector<32x384xbf16>
    %c0_45 = arith.constant 0 : index
    %c0_46 = arith.constant 0 : index
    %74 = vector.load %arg2[%c0_45, %c0_46] : memref<384x128xbf16, #tpu.memory_space<vmem>>, vector<384x128xbf16>
    %cst_47 = arith.constant dense<0.000000e+00> : vector<32x128xf32>
    %75 = tpu.matmul %73, %74, %cst_47 {dimension_numbers = #tpu.dot_dimension_numbers<[1], [0], [0], [1], [0, 0, 1, 1], [], []>} : vector<32x384xbf16>, vector<384x128xbf16>, vector<32x128xf32> -> vector<32x128xf32>
    %cst_48 = arith.constant 0.000000e+00 : f32
    %76 = vector.broadcast %cst_48 : f32 to vector<32x128xf32>
    %77 = arith.cmpf ogt, %75, %76 : vector<32x128xf32>
    %cst_49 = arith.constant 0.00999999977 : f32
    %78 = vector.broadcast %cst_49 : f32 to vector<32x128xf32>
    %79 = arith.mulf %78, %75 : vector<32x128xf32>
    %80 = arith.select %77, %75, %79 : vector<32x128xi1>, vector<32x128xf32>
    %cst_50 = arith.constant dense<0.000000e+00> : vector<128xf32>
    %81 = vector.multi_reduction <add>, %80, %cst_50 [0] : vector<32x128xf32> to vector<128xf32>
    %82 = vector.shape_cast %81 : vector<128xf32> to vector<1x128xf32>
    %83 = arith.mulf %80, %80 : vector<32x128xf32>
    %cst_51 = arith.constant dense<0.000000e+00> : vector<128xf32>
    %84 = vector.multi_reduction <add>, %83, %cst_51 [0] : vector<32x128xf32> to vector<128xf32>
    %85 = vector.shape_cast %84 : vector<128xf32> to vector<1x128xf32>
    %86 = tpu.iota {dimensions = array<i32: 0>} : vector<2x128xi32>
    %c0_i32_52 = arith.constant 0 : i32
    %87 = vector.broadcast %c0_i32_52 : i32 to vector<2x128xi32>
    %88 = arith.cmpi eq, %86, %87 : vector<2x128xi32>
    %89 = vector.shape_cast %82 : vector<1x128xf32> to vector<1x128xf32>
    %90 = vector.broadcast %89 : vector<1x128xf32> to vector<2x128xf32>
    %91 = vector.shape_cast %85 : vector<1x128xf32> to vector<1x128xf32>
    %92 = vector.broadcast %91 : vector<1x128xf32> to vector<2x128xf32>
    %93 = arith.select %88, %90, %92 : vector<2x128xi1>, vector<2x128xf32>
    %c0_53 = arith.constant 0 : index
    %c0_54 = arith.constant 0 : index
    %94 = vector.load %arg7[%c0_53, %c0_54] : memref<128x8xf32, #tpu.memory_space<vmem>>, vector<128x8xf32>
    %cst_55 = arith.constant dense<0.000000e+00> : vector<2x8xf32>
    %95 = tpu.matmul %93, %94, %cst_55 {dimension_numbers = #tpu.dot_dimension_numbers<[1], [0], [0], [1], [0, 0, 1, 1], [], []>} : vector<2x128xf32>, vector<128x8xf32>, vector<2x8xf32> -> vector<2x8xf32>
    %96 = vector.extract_strided_slice %95 {offsets = [0, 0], sizes = [1, 8], strides = [1, 1]} : vector<2x8xf32> to vector<1x8xf32>
    %cst_56 = arith.constant 0.001953125 : f32
    %97 = vector.broadcast %cst_56 : f32 to vector<1x8xf32>
    %98 = arith.mulf %96, %97 : vector<1x8xf32>
    %99 = vector.extract_strided_slice %95 {offsets = [1, 0], sizes = [1, 8], strides = [1, 1]} : vector<2x8xf32> to vector<1x8xf32>
    %cst_57 = arith.constant 0.001953125 : f32
    %100 = vector.broadcast %cst_57 : f32 to vector<1x8xf32>
    %101 = arith.mulf %99, %100 : vector<1x8xf32>
    %102 = arith.mulf %98, %98 : vector<1x8xf32>
    %103 = arith.subf %101, %102 : vector<1x8xf32>
    %c0_58 = arith.constant 0 : index
    %c0_59 = arith.constant 0 : index
    %104 = vector.load %arg5[%c0_58, %c0_59] : memref<1x8xf32, #tpu.memory_space<vmem>>, vector<1x8xf32>
    %cst_60 = arith.constant 9.99999974E-6 : f32
    %105 = vector.broadcast %cst_60 : f32 to vector<1x8xf32>
    %106 = arith.addf %103, %105 : vector<1x8xf32>
    %107 = math.rsqrt %106 : vector<1x8xf32>
    %108 = arith.mulf %104, %107 : vector<1x8xf32>
    %c0_61 = arith.constant 0 : index
    %c0_62 = arith.constant 0 : index
    %109 = vector.load %arg6[%c0_61, %c0_62] : memref<1x8xf32, #tpu.memory_space<vmem>>, vector<1x8xf32>
    %110 = arith.mulf %98, %108 : vector<1x8xf32>
    %111 = arith.subf %109, %110 : vector<1x8xf32>
    %112 = tpu.iota {dimensions = array<i32: 0>} : vector<2x8xi32>
    %c0_i32_63 = arith.constant 0 : i32
    %113 = vector.broadcast %c0_i32_63 : i32 to vector<2x8xi32>
    %114 = arith.cmpi eq, %112, %113 : vector<2x8xi32>
    %115 = vector.shape_cast %108 : vector<1x8xf32> to vector<1x8xf32>
    %116 = vector.broadcast %115 : vector<1x8xf32> to vector<2x8xf32>
    %117 = vector.shape_cast %111 : vector<1x8xf32> to vector<1x8xf32>
    %118 = vector.broadcast %117 : vector<1x8xf32> to vector<2x8xf32>
    %119 = arith.select %114, %116, %118 : vector<2x8xi1>, vector<2x8xf32>
    %c0_64 = arith.constant 0 : index
    %c0_65 = arith.constant 0 : index
    %120 = vector.load %arg8[%c0_64, %c0_65] : memref<8x128xf32, #tpu.memory_space<vmem>>, vector<8x128xf32>
    %cst_66 = arith.constant dense<0.000000e+00> : vector<2x128xf32>
    %121 = tpu.matmul %119, %120, %cst_66 {dimension_numbers = #tpu.dot_dimension_numbers<[1], [0], [0], [1], [0, 0, 1, 1], [], []>} : vector<2x8xf32>, vector<8x128xf32>, vector<2x128xf32> -> vector<2x128xf32>
    %122 = vector.extract_strided_slice %121 {offsets = [0, 0], sizes = [1, 128], strides = [1, 1]} : vector<2x128xf32> to vector<1x128xf32>
    %123 = vector.broadcast %122 : vector<1x128xf32> to vector<32x128xf32>
    %124 = arith.mulf %80, %123 : vector<32x128xf32>
    %125 = vector.extract_strided_slice %121 {offsets = [1, 0], sizes = [1, 128], strides = [1, 1]} : vector<2x128xf32> to vector<1x128xf32>
    %126 = vector.broadcast %125 : vector<1x128xf32> to vector<32x128xf32>
    %127 = arith.addf %124, %126 : vector<32x128xf32>
    %128 = vector.shape_cast %127 : vector<32x128xf32> to vector<2x16x128xf32>
    %c0_67 = arith.constant 0 : index
    %c0_68 = arith.constant 0 : index
    %c0_69 = arith.constant 0 : index
    %129 = vector.load %arg9[%c0_67, %c0_68, %c0_69] : memref<2x16x128xf32, #tpu.memory_space<vmem>>, vector<2x16x128xf32>
    tpu.vector_store %arg9[%c0_67, %c0_68, %c0_69], %128 {strides = array<i32>} : memref<2x16x128xf32, #tpu.memory_space<vmem>>, vector<2x16x128xf32>,
    return
  }
}

</mosaic_0001>

<bundles_post_ra>
// kernel: unet_conv_block.1
= control target key start
LH: loop header
LB: loop body
LE: loop exit
PB: predicated region body
PF: predicated region fallthrough
CT: control target
= control target key end

     0   :  { %v1356_v3 = vmov 0   ;;  %vm59_vm0 = vsmask.f32 256  ;;  %vm60_vm1 = vsmask.f32 4368  ;;  %vm525_vm14 = vcmask 64512   ;;  %s1817_s1 = inlined_call_operand.vmem [shape: bf16[384,128], index: 1, kind: input, shape index: {}]   ;;  %s1818_s0 = inlined_call_operand.vmem [shape: bf16[2,16,128], index: 0, kind: input, shape index: {}]   ;;  %s1819_s7 = inlined_call_operand.vmem [shape: f32[128,8], index: 7, kind: input, shape index: {}]   ;;  %s1820_s8 = inlined_call_operand.vmem [shape: f32[8,128], index: 8, kind: input, shape index: {}]   ;;  %s1821_s2 = inlined_call_operand.vmem [shape: bf16[384,128], index: 2, kind: input, shape index: {}]   ;;  %s1822_s3 = inlined_call_operand.vmem [shape: f32[1,8], index: 3, kind: input, shape index: {}]   ;;  %s1823_s4 = inlined_call_operand.vmem [shape: f32[1,8], index: 4, kind: input, shape index: {}]   ;;  %s1824_s5 = inlined_call_operand.vmem [shape: f32[1,8], index: 5, kind: input, shape index: {}]   ;;  %s1825_s6 = inlined_call_operand.vmem [shape: f32[1,8], index: 6, kind: input, shape index: {}]   ;;  %s1826_s9 = inlined_call_operand.vmem [shape: f32[2,16,128], index: 9, kind: output, shape index: {}]  }
   0x1   :  { %v1298_v0 = vld [vmem:[%s1817_s1 + $0x38] sm:$0xff]  ;;  %38 = vst [vmem:[#allocation2 + $0x4] sm:$0xf] %v1356_v3  ;;  %v1297_v4 = vld [vmem:[%s1817_s1 + $0x30] sm:$0xff]  ;;  %v1296_v7 = vld [vmem:[%s1817_s1 + $0x28] sm:$0xff] }
   0x2   :  { %v1306_v1 = vld [vmem:[%s1817_s1 + $0x78] sm:$0xff]  ;;  %359 = vmatpush.bf16.msra.mxu0 %v1298_v0  ;;  %v1305_v5 = vld [vmem:[%s1817_s1 + $0x70] sm:$0xff]  ;;  %39 = vst [vmem:[#allocation2 + $0x8] sm:$0xf] %v1356_v3  ;;  %v1304_v8 = vld [vmem:[%s1817_s1 + $0x68] sm:$0xff] }
   0x3   :  { %v1314_v2 = vld [vmem:[%s1817_s1 + $0xb8] sm:$0xff]  ;;  %378 = vmatpush.bf16.msra.mxu1 %v1306_v1  ;;  %v1313_v6 = vld [vmem:[%s1817_s1 + $0xb0] sm:$0xff]  ;;  %40 = vst [vmem:[#allocation2 + $0xc] sm:$0xf] %v1356_v3  ;;  %v1312_v9 = vld [vmem:[%s1817_s1 + $0xa8] sm:$0xff] }
   0x4   :  { %397 = vmatpush.bf16.msra.mxu2 %v1314_v2  ;;  %v33_v10 = vld [vmem:[%s1818_s0] sm:$0xff]   ;;  %41 = vst [vmem:[#allocation2 + $0x10] sm:$0xf] %v1356_v3  ;;  %v1294_v15 = vld [vmem:[%s1817_s1 + $0x18] sm:$0xff]  ;;  %vm108_vm2 = vsmask.f32 3328  ;;  %vm1477_vm4 = vmor %vm59_vm0, %vm60_vm1 }
   0x5   :  { %49 = vst [vmem:[#allocation2 + $0x8] sm:$0xff] %v33_v10   ;;  %v1295_v11 = vld [vmem:[%s1817_s1 + $0x20] sm:$0xff]  ;;  %v1302_v16 = vld [vmem:[%s1817_s1 + $0x58] sm:$0xff]  ;;  %v1293_v19 = vld [vmem:[%s1817_s1 + $0x10] sm:$0xff]  ;;  %vm109_vm3 = vsmask.f32 7440 }
   0x6   :  { %360 = vmatpush.bf16.msra.mxu0 %v1297_v4  ;;  %v1303_v12 = vld [vmem:[%s1817_s1 + $0x60] sm:$0xff]  ;;  %44 = vst [vmem:[#allocation2 + $0x1c] sm:$0xf] %v1356_v3  ;;  %v1310_v18 = vld [vmem:[%s1817_s1 + $0x98] sm:$0xff]  ;;  %v1301_v20 = vld [vmem:[%s1817_s1 + $0x50] sm:$0xff] }
   0x7   :  { %379 = vmatpush.bf16.msra.mxu1 %v1305_v5  ;;  %v1311_v13 = vld [vmem:[%s1817_s1 + $0xa0] sm:$0xff]  ;;  %45 = vst [vmem:[#allocation2 + $0x20] sm:$0xf] %v1356_v3  ;;  %v1309_v27 = vld [vmem:[%s1817_s1 + $0x90] sm:$0xff]  ;;  %v1292_v41 = vld [vmem:[%s1817_s1 + $0x8] sm:$0xff] }
   0x8   :  { %398 = vmatpush.bf16.msra.mxu2 %v1313_v6  ;;  %v53_v14 = vld [vmem:[#allocation2 + $0x4] sm:$0x8]  ;;  %46 = vst [vmem:[#allocation2 + $0x24] sm:$0xf] %v1356_v3  ;;  %vm1503_vm5 = vmor %vm108_vm2, %vm109_vm3  ;;  %v1291_v55 = vld [vmem:[%s1817_s1] sm:$0xff] }
   0x9   :  { %v63_v17 = vshrl.u32 %v53_v14, 16  ;;  %47 = vst [vmem:[#allocation2 + $0x28] sm:$0xf] %v1356_v3  ;;  %v1300_v42 = vld [vmem:[%s1817_s1 + $0x48] sm:$0xff]  ;;  %v1299_v56 = vld [vmem:[%s1817_s1 + $0x40] sm:$0xff] }
   0xa   :  { %361 = vmatpush.bf16.msra.mxu0 %v1296_v7  ;;  %564 = vst [vmem:[#allocation3 + $0x4] sm:$0xf] %v1356_v3  ;;  %v35_v45 = vld [vmem:[%s1818_s0 + $0x8] sm:$0xff]   ;;  %v1307_v59 = vld [vmem:[%s1817_s1 + $0x80] sm:$0xff] }
   0xb   :  { %380 = vmatpush.bf16.msra.mxu1 %v1304_v8  ;;  %v1083_v28 = vrot.slane %v63_v17, 11  ;;  %565 = vst [vmem:[#allocation3 + $0x8] sm:$0xf] %v1356_v3  ;;  %v106_v31 = vld [vmem:[#allocation2 + $0x10] sm:$0x1]  ;;  %v1308_v46 = vld [vmem:[%s1817_s1 + $0x88] sm:$0xff] }
   0xc   :  { %399 = vmatpush.bf16.msra.mxu2 %v1312_v9  ;;  %v54_v21 = vld [vmem:[#allocation2 + $0x8] sm:$0xf]  ;;  %v55_v22 = vld [vmem:[#allocation2 + $0xc] sm:$0xf]  ;;  %566 = vst [vmem:[#allocation3 + $0xc] sm:$0xf] %v1356_v3 }
   0xd   :  { %v68_v23 = vshrl.u32 %v54_v21, 16  ;;  %v71_v24 = vshll.u32 %v54_v21, 16  ;;  %v77_v25 = vshrl.u32 %v55_v22, 16  ;;  %v80_v26 = vshll.u32 %v55_v22, 16  ;;  %567 = vst [vmem:[#allocation3 + $0x10] sm:$0xf] %v1356_v3 }
   0xe   :  { %362 = vmatpush.bf16.msra.mxu0 %v1295_v11  ;;  %570 = vst [vmem:[#allocation3 + $0x1c] sm:$0xf] %v1356_v3  ;;  %v121_v40 = vshll.u32 %v106_v31, 16  ;;  %v56_v62 = vld [vmem:[#allocation2 + $0x1c] sm:$0x8] }
   0xf   :  { %381 = vmatpush.bf16.msra.mxu1 %v1303_v12  ;;  %v70_v29 = vrot.slane %v68_v23, 7  ;;  %v79_v30 = vrot.slane %v77_v25, 7  ;;  %v111_v33 = vrot.slane %v68_v23, 4  ;;  %v112_v34 = vrot.slane %v71_v24, 5  ;;  %571 = vst [vmem:[#allocation3 + $0x20] sm:$0xf] %v1356_v3 }
  0x10   :  { %400 = vmatpush.bf16.msra.mxu2 %v1311_v13  ;;  %v115_v35 = vrot.slane %v80_v26, 5  ;;  %v117_v36 = vrot.slane %v77_v25, 4  ;;  %572 = vst [vmem:[#allocation3 + $0x24] sm:$0xf] %v1356_v3  ;;  %v123_v50 = vrot.slane %v121_v40, 5  ;;  %v1289_v0 = vld [vmem:[%s1818_s0] sm:$0xff] }
  0x11   :  { %v73_v37 = vor.u32 %v71_v24, %v70_v29  ;;  %v75_v38 = vrot.slane %v70_v29, 4  ;;  %v82_v39 = vor.u32 %v80_v26, %v79_v30  ;;  %v113_v43 = vor.u32 %v112_v34, %v111_v33  ;;  %573 = vst [vmem:[#allocation3 + $0x28] sm:$0xf] %v1356_v3  ;;  %v107_v3 = vld [vmem:[#allocation2 + $0x28] sm:$0x1]  ;;  %v1550_v40 = vld [vmem:[%s1819_s7 + $0x68] sm:$0xff] }
  0x12   :  { %363 = vmatpush.bf16.msra.mxu0 %v1294_v15  ;;  %v118_v44 = vor.u32 %v117_v36, %v115_v35  ;;  %51 = vst [vmem:[#allocation2 + $0x20] sm:$0xff] %v35_v45   ;;  %v85_v2 = vshrl.u32 %v56_v62, 16  ;;  %v135_v11 = vshll.u32 %v107_v3, 16  ;;  %v1290_v36 = vld [vmem:[%s1818_s0 + $0x8] sm:$0xff]  ;;  %v1568_v45 = vld [vmem:[%s1819_s7 + $0x50] sm:$0xff] }
  0x13   :  { %382 = vmatpush.bf16.msra.mxu1 %v1302_v16  ;;  %v74_v47 = vsel %vm1477_vm4, %v1083_v28, %v73_v37  ;;  %v83_v48 = vsel %vm1477_vm4, %v75_v38, %v82_v39  ;;  %v114_v51 = vrot.slane %v113_v43, 4  ;;  %v1538_v38 = vld [vmem:[%s1819_s7 + $0x78] sm:$0xff]  ;;  %v1544_v39 = vld [vmem:[%s1819_s7 + $0x70] sm:$0xff] }
  0x14   :  { %401 = vmatpush.bf16.msra.mxu2 %v1310_v18  ;;  %v119_v52 = vrot.slane %v118_v44, 4  ;;  %v139_v53 = vunpack.c.l.b16 %v74_v47  ;;  %v140_v54 = vunpack.c.l.b16 %v83_v48  ;;  %v1084_v10 = vrot.slane %v85_v2, 11  ;;  %470 = vmatpush.msra.mxu3 %v1538_v38  ;;  %v1580_v47 = vld [vmem:[%s1819_s7 + $0x40] sm:$0xff]  ;;  %v1586_v48 = vld [vmem:[%s1819_s7 + $0x38] sm:$0xff] }
  0x15   :  { %v116_v57 = vsel %vm1503_vm5, %v114_v51, %v115_v35  ;;  %v137_v23 = vrot.slane %v135_v11, 5  ;;  %v1592_v51 = vld [vmem:[%s1819_s7 + $0x30] sm:$0xff] }
  0x16   :  { %364 = vmatpush.bf16.msra.mxu0 %v1293_v19  ;;  %v124_v58 = vsel %vm1503_vm5, %v119_v52, %v123_v50  ;;  %v159_v60 = vunpack.c.l.b16 %v116_v57  ;;  %v143_v63 = vpack.c.b16 %v140_v54, %v139_v53  ;;  %471 = vmatpush.msra.mxu3 %v1544_v39  ;;  %v1597_v54 = vld [vmem:[%s1819_s7 + $0x28] sm:$0xff]  ;;  %v1615_v57 = vld [vmem:[%s1819_s7 + $0x10] sm:$0xff] }
  0x17   :  { %383 = vmatpush.bf16.msra.mxu1 %v1301_v20  ;;  %v160_v61 = vunpack.c.l.b16 %v124_v58 }
  0x18   :  { %402 = vmatpush.bf16.msra.mxu2 %v1309_v27  ;;  %472 = vmatpush.msra.mxu3 %v1550_v40 }
  0x19   :  { %v163_v1 = vpack.c.b16 %v160_v61, %v159_v60  ;;  %v57_v4 = vld [vmem:[#allocation2 + $0x20] sm:$0xf]  ;;  %v58_v5 = vld [vmem:[#allocation2 + $0x24] sm:$0xf] }
  0x1a   :  { %365 = vmatpush.bf16.msra.mxu0 %v1292_v41  ;;  %v90_v6 = vshrl.u32 %v57_v4, 16  ;;  %v93_v7 = vshll.u32 %v57_v4, 16  ;;  %v99_v8 = vshrl.u32 %v58_v5, 16  ;;  %v102_v9 = vshll.u32 %v58_v5, 16  ;;  %v1556_v41 = vld [vmem:[%s1819_s7 + $0x60] sm:$0xff] }
  0x1b   :  { %384 = vmatpush.bf16.msra.mxu1 %v1300_v42  ;;  %473 = vmatpush.msra.mxu3 %v1556_v41  ;;  %v1562_v42 = vld [vmem:[%s1819_s7 + $0x58] sm:$0xff] }
  0x1c   :  { %403 = vmatpush.bf16.msra.mxu2 %v1308_v46  ;;  %v92_v12 = vrot.slane %v90_v6, 7  ;;  %v101_v13 = vrot.slane %v99_v8, 7  ;;  %v125_v14 = vrot.slane %v90_v6, 4  ;;  %v126_v15 = vrot.slane %v93_v7, 5  ;;  %v1574_v46 = vld [vmem:[%s1819_s7 + $0x48] sm:$0xff] }
  0x1d   :  { %v129_v16 = vrot.slane %v102_v9, 5  ;;  %v131_v17 = vrot.slane %v99_v8, 4  ;;  %474 = vmatpush.msra.mxu3 %v1562_v42 }
  0x1e   :  { %366 = vmatpush.bf16.msra.mxu0 %v1291_v55  ;;  %v95_v18 = vor.u32 %v93_v7, %v92_v12  ;;  %v97_v19 = vrot.slane %v92_v12, 4  ;;  %v104_v20 = vor.u32 %v102_v9, %v101_v13  ;;  %v127_v21 = vor.u32 %v126_v15, %v125_v14  ;;  %v1603_v55 = vld [vmem:[%s1819_s7 + $0x20] sm:$0xff] }
  0x1f   :  { %385 = vmatpush.bf16.msra.mxu1 %v1299_v56  ;;  %v132_v22 = vor.u32 %v131_v17, %v129_v16  ;;  %475 = vmatpush.msra.mxu3 %v1568_v45  ;;  %v1609_v56 = vld [vmem:[%s1819_s7 + $0x18] sm:$0xff] }
  0x20   :  { %404 = vmatpush.bf16.msra.mxu2 %v1307_v59  ;;  %v96_v24 = vsel %vm1477_vm4, %v1084_v10, %v95_v18  ;;  %v105_v25 = vsel %vm1477_vm4, %v97_v19, %v104_v20  ;;  %v128_v26 = vrot.slane %v127_v21, 4  ;;  %v1621_v59 = vld [vmem:[%s1819_s7 + $0x8] sm:$0xff] }
  0x21   :  { %367 = vmatmul.bf16.vlgmr.msra.gmra.mxu0 %v143_v63  ;;  %v133_v27 = vrot.slane %v132_v22, 4  ;;  %v141_v28 = vunpack.c.l.b16 %v96_v24  ;;  %v142_v29 = vunpack.c.l.b16 %v105_v25  ;;  %476 = vmatpush.msra.mxu3 %v1574_v46 }
  0x22   :  { %386 = vmatmul.bf16.vlgmr.msra.gmra.mxu1 %v1289_v0  ;;  %v130_v30 = vsel %vm1503_vm5, %v128_v26, %v129_v16  ;;  %v1627_v0 = vld [vmem:[%s1819_s7] sm:$0xff] }
  0x23   :  { %405 = vmatmul.bf16.vlgmr.msra.gmra.mxu2 %v163_v1  ;;  %v138_v31 = vsel %vm1503_vm5, %v133_v27, %v137_v23  ;;  %v161_v33 = vunpack.c.l.b16 %v130_v30  ;;  %v144_v35 = vpack.c.b16 %v142_v29, %v141_v28  ;;  %477 = vmatpush.msra.mxu3 %v1580_v47 }
  0x24   :  { %v162_v34 = vunpack.c.l.b16 %v138_v31 }
  0x25   :  { %478 = vmatpush.msra.mxu3 %v1586_v48 }
  0x26   :  { %v164_v37 = vpack.c.b16 %v162_v34, %v161_v33  ;;  %v450_v33 = vlaneseq }
  0x27   :  { %479 = vmatpush.msra.mxu3 %v1592_v51 }
  0x29   :  { %480 = vmatpush.msra.mxu3 %v1597_v54 }
  0x2b   :  { %481 = vmatpush.msra.mxu3 %v1603_v55 }
  0x2d   :  { %482 = vmatpush.msra.mxu3 %v1609_v56 }
  0x2f   :  { %483 = vmatpush.msra.mxu3 %v1615_v57 }
  0x31   :  { %372 = vmatmul.bf16.gmra.mxu0 %v144_v35  ;;  %484 = vmatpush.msra.mxu3 %v1621_v59 }
  0x32   :  { %391 = vmatmul.bf16.gmra.mxu1 %v1290_v36 }
  0x33   :  { %410 = vmatmul.bf16.gmra.mxu2 %v164_v37  ;;  %485 = vmatpush.msra.mxu3 %v1627_v0 }
  0x9e   :  { %v368_v43 = vpop.f32.mrf.mxu0 }
  0x9f   :  { %v387_v44 = vpop.f32.mrf.mxu1 }
  0xa0   :  { %v388_v62 = vadd.f32 %v387_v44, %v368_v43  ;;  %v1651_v43 = vshrl.u32 %v450_v33, 7  ;;  %v1331_v33 = vld [vmem:[%s1821_s2 + $0x80] sm:$0xff] }
  0xa2   :  { %vm452_vm10 = vcmp.eq.s32.totalorder %v1651_v43, 0 }
  0xa6   :  { %v406_v50 = vpop.f32.mrf.mxu2  ;;  %v370_v52 = vpop.f32.mrf.mxu0 }
  0xa7   :  { %v389_v53 = vpop.f32.mrf.mxu1  ;;  %v407_v3 = vadd.f32 %v406_v50, %v388_v62 }
  0xa8   :  { %v390_v63 = vadd.f32 %v389_v53, %v370_v52 }
  0xa9   :  { %v420_v7 = vmul.f32 0.01, %v407_v3  ;;  %vm416_vm7 = vcmp.gt.f32.partialorder %v407_v3, 0.0 }
  0xab   :  { %v1633_v12 = vsel %vm416_vm7, %v407_v3, %v420_v7  ;;  %v1329_v7 = vld [vmem:[%s1821_s2 + $0x70] sm:$0xff] }
  0xac   :  { %v437_v18 = vmul.f32 %v1633_v12, %v1633_v12 }
  0xae   :  { %v408_v58 = vpop.f32.mrf.mxu2  ;;  %v373_v60 = vpop.f32.mrf.mxu0 }
  0xaf   :  { %v392_v61 = vpop.f32.mrf.mxu1  ;;  %v409_v1 = vadd.f32 %v408_v58, %v390_v63 }
  0xb0   :  { %v393_v2 = vadd.f32 %v392_v61, %v373_v60 }
  0xb1   :  { %v421_v5 = vmul.f32 0.01, %v409_v1  ;;  %vm417_vm6 = vcmp.gt.f32.partialorder %v409_v1, 0.0 }
  0xb3   :  { %v1631_v11 = vsel %vm417_vm6, %v409_v1, %v421_v5  ;;  %v1330_v5 = vld [vmem:[%s1821_s2 + $0x78] sm:$0xff] }
  0xb4   :  { %v438_v15 = vmul.f32 %v1631_v11, %v1631_v11  ;;  %v428_v19 = vadd.f32 %v1631_v11, %v1633_v12  ;;  %898 = vmatpush.bf16.msrb.mxu1 %v1330_v5 }
  0xb6   :  { %v411_v4 = vpop.f32.mrf.mxu2  ;;  %v375_v9 = vpop.f32.mrf.mxu0  ;;  %v441_v22 = vadd.f32 %v438_v15, %v437_v18 }
  0xb7   :  { %v412_v6 = vadd.f32 %v411_v4, %v393_v2  ;;  %v394_v10 = vpop.f32.mrf.mxu1  ;;  %v524_v4 = vld [vmem:[%s1820_s8] sm:$0xff] }
  0xb8   :  { %v395_v14 = vadd.f32 %v394_v10, %v375_v9  ;;  %544 = vmatpush.msrb.mxu3 %v524_v4  ;;  %899 = vmatpush.bf16.msrb.mxu1 %v1329_v7 }
  0xb9   :  { %v422_v8 = vmul.f32 0.01, %v412_v6  ;;  %vm418_vm8 = vcmp.gt.f32.partialorder %v412_v6, 0.0 }
  0xbb   :  { %v1635_v13 = vsel %vm418_vm8, %v412_v6, %v422_v8  ;;  %v1322_v6 = vld [vmem:[%s1821_s2 + $0x38] sm:$0xff] }
  0xbc   :  { %v439_v20 = vmul.f32 %v1635_v13, %v1635_v13  ;;  %v429_v23 = vadd.f32 %v428_v19, %v1635_v13  ;;  %v1338_v8 = vld [vmem:[%s1821_s2 + $0xb8] sm:$0xff]  ;;  %879 = vmatpush.bf16.msrb.mxu0 %v1322_v6  ;;  %v1324_v19 = vld [vmem:[%s1821_s2 + $0x48] sm:$0xff] }
  0xbd   :  { %917 = vmatpush.bf16.msrb.mxu2 %v1338_v8 }
  0xbe   :  { %v413_v16 = vpop.f32.mrf.mxu2  ;;  %v442_v25 = vadd.f32 %v441_v22, %v439_v20  ;;  %v1336_v20 = vld [vmem:[%s1821_s2 + $0xa8] sm:$0xff]  ;;  %v1323_v22 = vld [vmem:[%s1821_s2 + $0x40] sm:$0xff] }
  0xbf   :  { %v414_v17 = vadd.f32 %v413_v16, %v395_v14 }
  0xc1   :  { %vm419_vm9 = vcmp.gt.f32.partialorder %v414_v17, 0.0  ;;  %v423_v21 = vmul.f32 0.01, %v414_v17 }
  0xc3   :  { %v1646_v24 = vsel %vm419_vm9, %v414_v17, %v423_v21  ;;  %v514_v17 = vld [vmem:[%s1823_s4] sm:$0x1] }
  0xc4   :  { %v430_v26 = vadd.f32 %v429_v23, %v1646_v24  ;;  %v440_v27 = vmul.f32 %v1646_v24, %v1646_v24  ;;  %v1319_v21 = vld [vmem:[%s1821_s2 + $0x20] sm:$0xff] }
  0xc5   :  { %v1335_v23 = vld [vmem:[%s1821_s2 + $0xa0] sm:$0xff] }
  0xc6   :  { %v431_v28 = vrot.slane %v430_v26, 4  ;;  %v443_v29 = vadd.f32 %v442_v25, %v440_v27  ;;  %v1318_v25 = vld [vmem:[%s1821_s2 + $0x18] sm:$0xff]  ;;  %v1317_v27 = vld [vmem:[%s1821_s2 + $0x10] sm:$0xff] }
  0xc8   :  { %v432_v30 = vadd.f32 %v431_v28, %v430_v26  ;;  %v444_v31 = vrot.slane %v443_v29, 4  ;;  %v1334_v26 = vld [vmem:[%s1821_s2 + $0x98] sm:$0xff]  ;;  %v1333_v28 = vld [vmem:[%s1821_s2 + $0x90] sm:$0xff] }
  0xca   :  { %v433_v34 = vrot.slane %v432_v30, 2  ;;  %v445_v35 = vadd.f32 %v444_v31, %v443_v29  ;;  %v1316_v29 = vld [vmem:[%s1821_s2 + $0x8] sm:$0xff]  ;;  %v1315_v31 = vld [vmem:[%s1821_s2] sm:$0xff] }
  0xcc   :  { %v434_v36 = vadd.f32 %v433_v34, %v432_v30  ;;  %v446_v37 = vrot.slane %v445_v35, 2  ;;  %v1332_v30 = vld [vmem:[%s1821_s2 + $0x88] sm:$0xff] }
  0xce   :  { %v435_v44 = vrot.slane %v434_v36, 1  ;;  %v447_v50 = vadd.f32 %v446_v37, %v445_v35 }
  0xd0   :  { %v448_v52 = vrot.slane %v447_v50, 1  ;;  %v436_v53 = vadd.f32 %v435_v44, %v434_v36 }
  0xd2   :  { %v449_v58 = vadd.f32 %v448_v52, %v447_v50 }
  0xd4   :  { %v453_v60 = vsel %vm452_vm10, %v436_v53, %v449_v58 }
  0xd5   :  { %486 = vmatmul.f32.vlgmr.msra.gmra.mxu3 %v453_v60 }
  0xd6   :  { %987 = vmatpush.msra.mxu3 %v1538_v38 }
  0xd8   :  { %988 = vmatpush.msra.mxu3 %v1544_v39  ;;  %v1328_v39 = vld [vmem:[%s1821_s2 + $0x68] sm:$0xff] }
  0xd9   :  { %900 = vmatpush.bf16.msrb.mxu1 %v1328_v39 }
  0xda   :  { %989 = vmatpush.msra.mxu3 %v1550_v40  ;;  %v1327_v40 = vld [vmem:[%s1821_s2 + $0x60] sm:$0xff] }
  0xdc   :  { %990 = vmatpush.msra.mxu3 %v1556_v41 }
  0xdd   :  { %901 = vmatpush.bf16.msrb.mxu1 %v1327_v40 }
  0xde   :  { %991 = vmatpush.msra.mxu3 %v1562_v42  ;;  %v1326_v42 = vld [vmem:[%s1821_s2 + $0x58] sm:$0xff] }
  0xe0   :  { %992 = vmatpush.msra.mxu3 %v1568_v45  ;;  %v496_v45 = vld [vmem:[%s1822_s3] sm:$0x1] }
  0xe1   :  { %902 = vmatpush.bf16.msrb.mxu1 %v1326_v42 }
  0xe2   :  { %993 = vmatpush.msra.mxu3 %v1574_v46 }
  0xe4   :  { %994 = vmatpush.msra.mxu3 %v1580_v47 }
  0xe6   :  { %995 = vmatpush.msra.mxu3 %v1586_v48 }
  0xe8   :  { %996 = vmatpush.msra.mxu3 %v1592_v51 }
  0xea   :  { %997 = vmatpush.msra.mxu3 %v1597_v54 }
  0xec   :  { %998 = vmatpush.msra.mxu3 %v1603_v55 }
  0xee   :  { %999 = vmatpush.msra.mxu3 %v1609_v56  ;;  %v1321_v56 = vld [vmem:[%s1821_s2 + $0x30] sm:$0xff] }
  0xef   :  { %880 = vmatpush.bf16.msrb.mxu0 %v1321_v56 }
  0xf0   :  { %1000 = vmatpush.msra.mxu3 %v1615_v57  ;;  %v1325_v57 = vld [vmem:[%s1821_s2 + $0x50] sm:$0xff] }
  0xf1   :  { %903 = vmatpush.bf16.msrb.mxu1 %v1325_v57 }
  0xf2   :  { %1001 = vmatpush.msra.mxu3 %v1621_v59  ;;  %v1337_v59 = vld [vmem:[%s1821_s2 + $0xb0] sm:$0xff] }
  0xf3   :  { %918 = vmatpush.bf16.msrb.mxu2 %v1337_v59  ;;  %v582_v59 = vld [vmem:[#allocation3 + $0x1c] sm:$0x8] }
  0xf4   :  { %1002 = vmatpush.msra.mxu3 %v1627_v0  ;;  %v1320_v0 = vld [vmem:[%s1821_s2 + $0x28] sm:$0xff] }
  0xf5   :  { %881 = vmatpush.bf16.msrb.mxu0 %v1320_v0  ;;  %904 = vmatpush.bf16.msrb.mxu1 %v1324_v19 }
  0xf7   :  { %919 = vmatpush.bf16.msrb.mxu2 %v1336_v20 }
  0xf9   :  { %882 = vmatpush.bf16.msrb.mxu0 %v1319_v21  ;;  %905 = vmatpush.bf16.msrb.mxu1 %v1323_v22 }
  0xfb   :  { %920 = vmatpush.bf16.msrb.mxu2 %v1335_v23 }
  0xfd   :  { %883 = vmatpush.bf16.msrb.mxu0 %v1318_v25 }
  0xff   :  { %921 = vmatpush.bf16.msrb.mxu2 %v1334_v26 }
 0x101   :  { %884 = vmatpush.bf16.msrb.mxu0 %v1317_v27 }
 0x103   :  { %922 = vmatpush.bf16.msrb.mxu2 %v1333_v28 }
 0x105   :  { %885 = vmatpush.bf16.msrb.mxu0 %v1316_v29 }
 0x107   :  { %923 = vmatpush.bf16.msrb.mxu2 %v1332_v30  ;;  %v608_v30 = vshrl.u32 %v582_v59, 16 }
 0x109   :  { %886 = vmatpush.bf16.msrb.mxu0 %v1315_v31 }
 0x10b   :  { %924 = vmatpush.bf16.msrb.mxu2 %v1331_v33 }
 0x158   :  { %v487_v61 = vpop.f32.mrf.mxu3 }
 0x159   :  { %v490_v62 = vmul.f32 0.001953125, %v487_v61 }
 0x15b   :  { %v491_v63 = vmul.f32 %v490_v62, %v490_v62 }
 0x15d   :  { %v493_v1 = vrot.slane %v491_v63, 7 }
 0x15f   :  { %v495_v2 = vsub.f32 %v490_v62, %v493_v1 }
 0x161   :  { %v497_v3 = vadd.f32 1e-05, %v495_v2 }
 0x163   :  { %1352 = vrsqrt.f32 %v497_v3  ;;  %vm504_vm12 = vweird.f32 %v497_v3 }
 0x169   :  { %v1353_v38 = vpop.eup %1352 }
 0x16a   :  { %v499_v9 = vmul.f32 %v1353_v38, %v497_v3  ;;  %vm505_vm11 = vweird.f32 %v1353_v38 }
 0x16b   :  { %vm506_vm13 = vmor %vm504_vm12, %vm505_vm11 }
 0x16c   :  { %v500_v10 = vmul.f32 %v1353_v38, %v499_v9 }
 0x16e   :  { %v501_v14 = vmul.f32 0.5, %v500_v10 }
 0x170   :  { %v502_v15 = vsub.f32 1.5, %v501_v14 }
 0x172   :  { %v503_v41 = vmul.f32 %v1353_v38, %v502_v15 }
 0x174   :  { %v507_v16 = vsel %vm506_vm13, %v1353_v38, %v503_v41 }
 0x175   :  { %509 = vst [vmem:[#allocation1] sm:$0xff] %v507_v16 }
 0x17c   :  { %v511_v46 = vld [vmem:[#allocation1 + $0x1] ss:$9 sm:$0xff] }
 0x17d   :  { %v513_v47 = vmul.f32 %v511_v46, %v496_v45 }
 0x17f   :  { %v515_v48 = vmul.f32 %v513_v47, %v490_v62  ;;  %v518_v18 = vperm.slane %v513_v47, 0 }
 0x181   :  { %v516_v51 = vsub.f32 %v514_v17, %v515_v48 }
 0x183   :  { %v521_v54 = vperm.slane %v516_v51, 0 }
 0x185   :  { %v523_v55 = vsel %vm452_vm10, %v518_v18, %v521_v54 }
 0x186   :  { %1189 = vmatmul.msk.f32.vlgmr.msrb.gmra.mxu3 %vm525_vm14, %v523_v55 }
 0x187   :  { %1060 = vmatpush.msrb.mxu3 %v524_v4 }
 0x209   :  { %v546_v34 = vpop.f32.mrf.mxu3 }
 0x20a   :  { %v549_v35 = vperm.slane %v546_v34, 0  ;;  %v554_v36 = vperm.slane %v546_v34, 1 }
 0x20c   :  { %v550_v37 = vmul.f32 %v549_v35, %v1633_v12  ;;  %v551_v44 = vmul.f32 %v549_v35, %v1631_v11  ;;  %v552_v50 = vmul.f32 %v549_v35, %v1635_v13  ;;  %v553_v52 = vmul.f32 %v549_v35, %v1646_v24  ;;  %v579_v12 = vld [vmem:[#allocation3 + $0x4] sm:$0x8]  ;;  %v629_v13 = vld [vmem:[#allocation3 + $0x10] sm:$0x1] }
 0x20d   :  { %v586_v11 = vshrl.u32 %v579_v12, 16  ;;  %v641_v41 = vshll.u32 %v629_v13, 16 }
 0x20e   :  { %v555_v53 = vadd.f32 %v554_v36, %v550_v37  ;;  %v556_v58 = vadd.f32 %v554_v36, %v551_v44  ;;  %v557_v60 = vadd.f32 %v554_v36, %v552_v50  ;;  %v558_v61 = vadd.f32 %v554_v36, %v553_v52 }
 0x20f   :  { %v1190_v15 = vrot.slane %v586_v11, 11  ;;  %v643_v19 = vrot.slane %v641_v41, 5 }
 0x210   :  { %v559_v62 = vpack.c.bf16 %v555_v53, %v555_v53  ;;  %v560_v63 = vpack.c.bf16 %v556_v58, %v556_v58  ;;  %v1342_v1 = vpack.c.bf16 %v556_v58, %v555_v53  ;;  %v1347_v2 = vpack.c.bf16 %v558_v61, %v557_v60  ;;  %v630_v58 = vld [vmem:[#allocation3 + $0x28] sm:$0x1] }
 0x211   :  { %v561_v6 = vpack.c.bf16 %v557_v60, %v557_v60  ;;  %v562_v8 = vpack.c.bf16 %v558_v61, %v558_v61 }
 0x212   :  { %1349 = vst [vmem:[#allocation3 + $0x8] sm:$0xff] %v1342_v1   ;;  %v671_v3 = vunpack.c.l.b16 %v559_v62  ;;  %v672_v4 = vunpack.c.l.b16 %v560_v63 }
 0x213   :  { %1350 = vst [vmem:[#allocation3 + $0x20] sm:$0xff] %v1347_v2   ;;  %v673_v40 = vunpack.c.l.b16 %v561_v6  ;;  %v674_v17 = vunpack.c.l.b16 %v562_v8  ;;  %v655_v2 = vshll.u32 %v630_v58, 16 }
 0x214   :  { %v675_v5 = vpack.c.b16 %v672_v4, %v671_v3  ;;  %v1191_v3 = vrot.slane %v608_v30, 11 }
 0x215   :  { %v676_v31 = vpack.c.b16 %v674_v17, %v673_v40  ;;  %v657_v13 = vrot.slane %v655_v2, 5 }
 0x216   :  { %906 = vmatmul.bf16.vlgmr.msrb.gmra.mxu1 %v675_v5 }
 0x219   :  { %v580_v7 = vld [vmem:[#allocation3 + $0x8] sm:$0xf]  ;;  %v581_v24 = vld [vmem:[#allocation3 + $0xc] sm:$0xf] }
 0x21a   :  { %v591_v38 = vshrl.u32 %v580_v7, 16  ;;  %v594_v9 = vshll.u32 %v580_v7, 16  ;;  %v600_v10 = vshrl.u32 %v581_v24, 16  ;;  %v603_v39 = vshll.u32 %v581_v24, 16  ;;  %v583_v14 = vld [vmem:[#allocation3 + $0x20] sm:$0xf] }
 0x21b   :  { %v584_v47 = vld [vmem:[#allocation3 + $0x24] sm:$0xf]  ;;  %v613_v54 = vshrl.u32 %v583_v14, 16  ;;  %v616_v20 = vshll.u32 %v583_v14, 16 }
 0x21c   :  { %v593_v16 = vrot.slane %v591_v38, 7  ;;  %v602_v42 = vrot.slane %v600_v10, 7  ;;  %v631_v45 = vrot.slane %v591_v38, 4  ;;  %v632_v46 = vrot.slane %v594_v9, 5 }
 0x21d   :  { %v635_v48 = vrot.slane %v603_v39, 5  ;;  %v637_v51 = vrot.slane %v600_v10, 4  ;;  %v622_v21 = vshrl.u32 %v584_v47, 16  ;;  %v625_v26 = vshll.u32 %v584_v47, 16 }
 0x21e   :  { %v596_v18 = vor.u32 %v594_v9, %v593_v16  ;;  %v598_v55 = vrot.slane %v593_v16, 4  ;;  %v605_v56 = vor.u32 %v603_v39, %v602_v42  ;;  %v633_v57 = vor.u32 %v632_v46, %v631_v45 }
 0x21f   :  { %v638_v0 = vor.u32 %v637_v51, %v635_v48  ;;  %v615_v34 = vrot.slane %v613_v54, 7  ;;  %v645_v35 = vrot.slane %v613_v54, 4  ;;  %v646_v50 = vrot.slane %v616_v20, 5 }
 0x220   :  { %v597_v22 = vsel %vm1477_vm4, %v1190_v15, %v596_v18  ;;  %v606_v23 = vsel %vm1477_vm4, %v598_v55, %v605_v56  ;;  %v634_v25 = vrot.slane %v633_v57, 4  ;;  %v624_v53 = vrot.slane %v622_v21, 7 }
 0x221   :  { %v659_v27 = vunpack.c.l.b16 %v597_v22  ;;  %v660_v28 = vunpack.c.l.b16 %v606_v23  ;;  %v639_v29 = vrot.slane %v638_v0, 4  ;;  %v649_v60 = vrot.slane %v625_v26, 5 }
 0x222   :  { %v636_v33 = vsel %vm1503_vm5, %v634_v25, %v635_v48  ;;  %v651_v61 = vrot.slane %v622_v21, 4  ;;  %v647_v63 = vor.u32 %v646_v50, %v645_v35  ;;  %v618_v4 = vor.u32 %v616_v20, %v615_v34 }
 0x223   :  { %v663_v36 = vpack.c.b16 %v660_v28, %v659_v27  ;;  %v644_v37 = vsel %vm1503_vm5, %v639_v29, %v643_v19  ;;  %v679_v44 = vunpack.c.l.b16 %v636_v33  ;;  %v620_v5 = vrot.slane %v615_v34, 4 }
 0x224   :  { %v680_v52 = vunpack.c.l.b16 %v644_v37  ;;  %v652_v1 = vor.u32 %v651_v61, %v649_v60  ;;  %v627_v12 = vor.u32 %v625_v26, %v624_v53  ;;  %v648_v11 = vrot.slane %v647_v63, 4 }
 0x225   :  { %887 = vmatmul.bf16.vlgmr.msrb.gmra.mxu0 %v663_v36  ;;  %v619_v7 = vsel %vm1477_vm4, %v1191_v3, %v618_v4 }
 0x226   :  { %911 = vmatmul.bf16.gmra.mxu1 %v676_v31  ;;  %v683_v62 = vpack.c.b16 %v680_v52, %v679_v44  ;;  %v653_v6 = vrot.slane %v652_v1, 4  ;;  %v628_v24 = vsel %vm1477_vm4, %v620_v5, %v627_v12  ;;  %v661_v8 = vunpack.c.l.b16 %v619_v7 }
 0x227   :  { %v662_v38 = vunpack.c.l.b16 %v628_v24  ;;  %v650_v9 = vsel %vm1503_vm5, %v648_v11, %v649_v60 }
 0x228   :  { %925 = vmatmul.bf16.vlgmr.msrb.gmra.mxu2 %v683_v62  ;;  %v658_v10 = vsel %vm1503_vm5, %v653_v6, %v657_v13  ;;  %v681_v39 = vunpack.c.l.b16 %v650_v9 }
 0x229   :  { %v682_v14 = vunpack.c.l.b16 %v658_v10  ;;  %v664_v15 = vpack.c.b16 %v662_v38, %v661_v8 }
 0x22b   :  { %v684_v40 = vpack.c.b16 %v682_v14, %v681_v39 }
 0x235   :  { %892 = vmatmul.bf16.gmra.mxu0 %v664_v15 }
 0x238   :  { %930 = vmatmul.bf16.gmra.mxu2 %v684_v40 }
 0x293   :  { %v907_v16 = vpop.f32.mrf.mxu1 }
 0x29b   :  { %v909_v32 = vpop.f32.mrf.mxu1 }
 0x2a2   :  { %v888_v41 = vpop.f32.mrf.mxu0 }
 0x2a3   :  { %v912_v48 = vpop.f32.mrf.mxu1  ;;  %v908_v51 = vadd.f32 %v907_v16, %v888_v41  ;;  %v1013_v16 = vld [vmem:[%s1824_s5] sm:$0x1] }
 0x2aa   :  { %v890_v42 = vpop.f32.mrf.mxu0 }
 0x2ab   :  { %v926_v45 = vpop.f32.mrf.mxu2  ;;  %v910_v17 = vadd.f32 %v909_v32, %v890_v42  ;;  %v914_v21 = vpop.f32.mrf.mxu1  ;;  %v1031_v32 = vld [vmem:[%s1825_s6] sm:$0x1] }
 0x2ac   :  { %v927_v18 = vadd.f32 %v926_v45, %v908_v51 }
 0x2ae   :  { %v940_v59 = vmul.f32 0.01, %v927_v18  ;;  %vm936_vm0 = vcmp.gt.f32.partialorder %v927_v18, 0.0 }
 0x2b0   :  { %v1778_v22 = vsel %vm936_vm0, %v927_v18, %v940_v59 }
 0x2b1   :  { %v957_v29 = vmul.f32 %v1778_v22, %v1778_v22 }
 0x2b2   :  { %v893_v47 = vpop.f32.mrf.mxu0 }
 0x2b3   :  { %v928_v46 = vpop.f32.mrf.mxu2  ;;  %v913_v49 = vadd.f32 %v912_v48, %v893_v47 }
 0x2b4   :  { %v929_v54 = vadd.f32 %v928_v46, %v910_v17 }
 0x2b6   :  { %v941_v56 = vmul.f32 0.01, %v929_v54  ;;  %vm937_vm15 = vcmp.gt.f32.partialorder %v929_v54, 0.0 }
 0x2b8   :  { %v1776_v20 = vsel %vm937_vm15, %v929_v54, %v941_v56 }
 0x2b9   :  { %v958_v26 = vmul.f32 %v1776_v20, %v1776_v20  ;;  %v948_v30 = vadd.f32 %v1776_v20, %v1778_v22 }
 0x2ba   :  { %v895_v19 = vpop.f32.mrf.mxu0 }
 0x2bb   :  { %v931_v55 = vpop.f32.mrf.mxu2  ;;  %v915_v23 = vadd.f32 %v914_v21, %v895_v19  ;;  %v961_v34 = vadd.f32 %v958_v26, %v957_v29 }
 0x2bc   :  { %v932_v57 = vadd.f32 %v931_v55, %v913_v49 }
 0x2be   :  { %v942_v0 = vmul.f32 0.01, %v932_v57  ;;  %vm938_vm1 = vcmp.gt.f32.partialorder %v932_v57, 0.0 }
 0x2c0   :  { %v1780_v25 = vsel %vm938_vm1, %v932_v57, %v942_v0 }
 0x2c1   :  { %v959_v31 = vmul.f32 %v1780_v25, %v1780_v25  ;;  %v949_v35 = vadd.f32 %v948_v30, %v1780_v25 }
 0x2c3   :  { %v933_v27 = vpop.f32.mrf.mxu2  ;;  %v962_v37 = vadd.f32 %v961_v34, %v959_v31 }
 0x2c4   :  { %v934_v28 = vadd.f32 %v933_v27, %v915_v23 }
 0x2c6   :  { %vm939_vm2 = vcmp.gt.f32.partialorder %v934_v28, 0.0  ;;  %v943_v33 = vmul.f32 0.01, %v934_v28 }
 0x2c8   :  { %v947_v36 = vsel %vm939_vm2, %v934_v28, %v943_v33 }
 0x2c9   :  { %v950_v44 = vadd.f32 %v949_v35, %v947_v36  ;;  %v960_v50 = vmul.f32 %v947_v36, %v947_v36 }
 0x2cb   :  { %v951_v52 = vrot.slane %v950_v44, 4  ;;  %v963_v53 = vadd.f32 %v962_v37, %v960_v50 }
 0x2cd   :  { %v952_v58 = vadd.f32 %v951_v52, %v950_v44  ;;  %v964_v60 = vrot.slane %v963_v53, 4 }
 0x2cf   :  { %v953_v61 = vrot.slane %v952_v58, 2  ;;  %v965_v62 = vadd.f32 %v964_v60, %v963_v53 }
 0x2d1   :  { %v954_v63 = vadd.f32 %v953_v61, %v952_v58  ;;  %v966_v1 = vrot.slane %v965_v62, 2 }
 0x2d3   :  { %v955_v2 = vrot.slane %v954_v63, 1  ;;  %v967_v3 = vadd.f32 %v966_v1, %v965_v62 }
 0x2d5   :  { %v968_v4 = vrot.slane %v967_v3, 1  ;;  %v956_v5 = vadd.f32 %v955_v2, %v954_v63 }
 0x2d7   :  { %v969_v12 = vadd.f32 %v968_v4, %v967_v3 }
 0x2d9   :  { %v970_v11 = vsel %vm452_vm10, %v956_v5, %v969_v12 }
 0x2da   :  { %1003 = vmatmul.f32.vlgmr.msra.gmra.mxu3 %v970_v11 }
 0x35d   :  { %v1004_v6 = vpop.f32.mrf.mxu3 }
 0x35e   :  { %v1007_v13 = vmul.f32 0.001953125, %v1004_v6 }
 0x360   :  { %v1008_v7 = vmul.f32 %v1007_v13, %v1007_v13 }
 0x362   :  { %v1010_v24 = vrot.slane %v1008_v7, 7 }
 0x364   :  { %v1012_v8 = vsub.f32 %v1007_v13, %v1010_v24 }
 0x366   :  { %v1014_v38 = vadd.f32 1e-05, %v1012_v8 }
 0x368   :  { %1354 = vrsqrt.f32 %v1014_v38  ;;  %vm1021_vm4 = vweird.f32 %v1014_v38 }
 0x36e   :  { %v1355_v9 = vpop.eup %1354 }
 0x36f   :  { %v1016_v10 = vmul.f32 %v1355_v9, %v1014_v38  ;;  %vm1022_vm3 = vweird.f32 %v1355_v9 }
 0x370   :  { %vm1023_vm5 = vmor %vm1021_vm4, %vm1022_vm3 }
 0x371   :  { %v1017_v39 = vmul.f32 %v1355_v9, %v1016_v10 }
 0x373   :  { %v1018_v14 = vmul.f32 0.5, %v1017_v39 }
 0x375   :  { %v1019_v15 = vsub.f32 1.5, %v1018_v14 }
 0x377   :  { %v1020_v40 = vmul.f32 %v1355_v9, %v1019_v15 }
 0x379   :  { %v1024_v41 = vsel %vm1023_vm5, %v1355_v9, %v1020_v40 }
 0x37a   :  { %1026 = vst [vmem:[#allocation1] sm:$0xff] %v1024_v41 }
 0x381   :  { %v1028_v42 = vld [vmem:[#allocation1 + $0x1] ss:$9 sm:$0xff] }
 0x382   :  { %v1030_v45 = vmul.f32 %v1028_v42, %v1013_v16 }
 0x384   :  { %v1032_v46 = vmul.f32 %v1030_v45, %v1007_v13  ;;  %v1035_v17 = vperm.slane %v1030_v45, 0 }
 0x386   :  { %v1033_v47 = vsub.f32 %v1031_v32, %v1032_v46 }
 0x388   :  { %v1038_v48 = vperm.slane %v1033_v47, 0 }
 0x38a   :  { %v1040_v51 = vsel %vm452_vm10, %v1035_v17, %v1038_v48 }
 0x38b   :  { %1288 = vmatmul.msk.f32.vlgmr.msrb.gmra.mxu3 %vm525_vm14, %v1040_v51 }
 0x40e   :  { %v1062_v54 = vpop.f32.mrf.mxu3 }
 0x40f   :  { %v1065_v18 = vperm.slane %v1062_v54, 0  ;;  %v1070_v49 = vperm.slane %v1062_v54, 1 }
 0x411   :  { %v1066_v55 = vmul.f32 %v1065_v18, %v1778_v22  ;;  %v1067_v56 = vmul.f32 %v1065_v18, %v1776_v20  ;;  %v1068_v57 = vmul.f32 %v1065_v18, %v1780_v25  ;;  %v1069_v59 = vmul.f32 %v1065_v18, %v947_v36 }
 0x413   :  { %v1071_v0 = vadd.f32 %v1070_v49, %v1066_v55  ;;  %v1072_v19 = vadd.f32 %v1070_v49, %v1067_v56  ;;  %v1073_v21 = vadd.f32 %v1070_v49, %v1068_v57  ;;  %v1074_v23 = vadd.f32 %v1070_v49, %v1069_v59 }
 0x415   :  { %1075 = vst [vmem:[%s1826_s9] sm:$0xff] %v1071_v0 }
 0x416   :  { %1076 = vst [vmem:[%s1826_s9 + $0x8] sm:$0xff] %v1072_v19 }
 0x417   :  { %1077 = vst [vmem:[%s1826_s9 + $0x10] sm:$0xff] %v1073_v21 }
 0x418   :  { %1078 = vst [vmem:[%s1826_s9 + $0x18] sm:$0xff] %v1074_v23 }

</bundles_post_ra>
